<compile_context>
chip_gen: v7x
topology: tpu7x:2x2x1
jax: 0.10.0
libtpu: 0.0.40
codegen_flags: <defaults>
</compile_context>

<pallas_src>
import jax
import jax.numpy as jnp
from jax.experimental import pallas as pl
from jax.experimental.pallas import tpu as pltpu


def _bayes_ele_cox_kernel(x_ref, w_ref, b2_ref, mask_ref, out_ref):
    # x_ref    : (Bt, F)      input features for this batch tile
    # w_ref    : (2, S, F)    [0] = w1 samples, [1] = w2 samples pre-scaled by 1/(1-p)
    # b2_ref   : (S, 1)       Bayesian linear bias, one per sample
    # mask_ref : (S, Bt, F)   int8 dropout keep mask (0/1)
    # out_ref  : (S, Bt)      logits (batch on the lane axis)
    x = x_ref[...].astype(jnp.float32)                     # (Bt, F)
    w1 = w_ref[0].astype(jnp.float32)                      # (S, F)
    w2 = w_ref[1].astype(jnp.float32)                      # (S, F), includes 1/(1-p)
    keep = mask_ref[...].astype(jnp.float32)               # (S, Bt, F)

    # l1 (elementwise linear) + ReLU + dropout, all S samples at once
    h = jnp.maximum(x[None, :, :] * w1[:, None, :], 0.0) * keep     # (S, Bt, F)
    # l2 (linear F -> 1): lane reduction over F (XLU; intentionally no MXU)
    out_ref[...] = jnp.sum(h * w2[:, None, :], axis=-1) + b2_ref[...]   # (S, Bt)


def bayes_ele_cox_forward(x, w1, w2, b2, keep_mask, dropout_p):
    """x: (B, F); w1, w2: (S, F); b2: (S,); keep_mask: (S, B, F) bool -> (S, B)."""
    B, F = x.shape
    S = w1.shape[0]

    # Fold the inverted-dropout scale into w2 and coalesce the two weight
    # tensors into one input (single DMA).
    w2_scaled = w2 * (1.0 / (1.0 - dropout_p))
    w_packed = jnp.stack([w1, w2_scaled], axis=0)          # (2, S, F)
    b2_2d = b2.reshape(S, 1).astype(jnp.float32)
    mask_i8 = keep_mask.astype(jnp.int8)                   # 4x less HBM than f32

    # Grid over batch tiles only (single step at small B); all S samples are
    # folded into the kernel body.
    bt = B if B < 128 else 128
    assert B % bt == 0
    grid = (B // bt,)

    out = pl.pallas_call(
        _bayes_ele_cox_kernel,
        out_shape=jax.ShapeDtypeStruct((S, B), jnp.float32),
        grid=grid,
        in_specs=[
            pl.BlockSpec((bt, F), lambda i: (i, 0)),        # x batch tile
            pl.BlockSpec((2, S, F), lambda i: (0, 0, 0)),   # packed weights (resident)
            pl.BlockSpec((S, 1), lambda i: (0, 0)),         # bias (resident)
            pl.BlockSpec((S, bt, F), lambda i: (0, i, 0)),  # int8 dropout mask tile
        ],
        out_specs=pl.BlockSpec((S, bt), lambda i: (0, i)),  # lane-dense (S, Bt) output
        compiler_params=pltpu.CompilerParams(
            dimension_semantics=("parallel",)),
    )(x, w_packed, b2_2d, mask_i8)
    return out                                              # (S, B), already squeezed


def _softplus(r):
    return jnp.log1p(jnp.exp(r))


def make_sampled_params(key, in_features, n_samples):
    """Deterministic init of Bayesian params + reparameterized weight samples."""
    k1, k2, k3, k4, k5 = jax.random.split(key, 5)
    # BayesianElementwiseLinear: mu/rho per feature
    w1_mu = 0.1 * jax.random.normal(k1, (in_features,), dtype=jnp.float32)
    w1_rho = jnp.full((in_features,), -3.0, dtype=jnp.float32)
    # BayesianLinear(in_features, 1): weight mu/rho (F,), bias mu/rho scalar
    w2_mu = 0.1 * jax.random.normal(k2, (in_features,), dtype=jnp.float32)
    w2_rho = jnp.full((in_features,), -3.0, dtype=jnp.float32)
    b2_mu = jnp.zeros((), dtype=jnp.float32)
    b2_rho = jnp.full((), -3.0, dtype=jnp.float32)

    eps1 = jax.random.normal(k3, (n_samples, in_features), dtype=jnp.float32)
    eps2 = jax.random.normal(k4, (n_samples, in_features), dtype=jnp.float32)
    epsb = jax.random.normal(k5, (n_samples,), dtype=jnp.float32)

    w1 = w1_mu[None, :] + _softplus(w1_rho)[None, :] * eps1   # (S, F)
    w2 = w2_mu[None, :] + _softplus(w2_rho)[None, :] * eps2   # (S, F)
    b2 = b2_mu + _softplus(b2_rho) * epsb                     # (S,)
    return w1, w2, b2


if __name__ == "__main__":
    B, F, S = 8, 32, 4          # batch, in_features, n_samples
    dropout_p = 0.25            # config.dropout

    key = jax.random.PRNGKey(0)
    kx, kw, kd = jax.random.split(key, 3)

    x = jax.random.normal(kx, (B, F), dtype=jnp.float32)
    w1, w2, b2 = make_sampled_params(kw, F, S)

    # Inverted-dropout keep mask (F.dropout default training=True).
    # TODO(synk): cannot reproduce torch's RNG stream bit-exactly; mask drawn with jax.random.
    keep = jax.random.bernoulli(kd, 1.0 - dropout_p, (S, B, F))

    out = bayes_ele_cox_forward(x, w1, w2, b2, keep, dropout_p)
    out = jax.block_until_ready(out)

    # Pure-JAX reference check (mask scaled the "PyTorch way": on activations)
    drop_mask = keep.astype(jnp.float32) / (1.0 - dropout_p)
    h_ref = jnp.maximum(x[None, :, :] * w1[:, None, :], 0.0) * drop_mask
    ref = jnp.sum(h_ref * w2[:, None, :], axis=-1) + b2[:, None]
    assert out.shape == (S, B)
    assert jnp.allclose(out, ref, atol=1e-5, rtol=1e-5)

    print("KERNEL_OK")
</pallas_src>

<mosaic_0001>
module attributes {stable_mosaic.version = 11 : i64} {
  func.func @_bayes_ele_cox_kernel(%arg0: i32, %arg1: memref<8x32xf32, #tpu.memory_space<vmem>>, %arg2: memref<2x4x32xf32, #tpu.memory_space<vmem>>, %arg3: memref<4x1xf32, #tpu.memory_space<vmem>>, %arg4: memref<4x8x32xi8, #tpu.memory_space<vmem>>, %arg5: memref<4x8xf32, #tpu.memory_space<vmem>>) attributes {dimension_semantics = [#tpu.dimension_semantics<parallel>], iteration_bounds = array<i64: 1>, scalar_prefetch = 0 : i64, scratch_operands = 0 : i64, tpu.core_type = #tpu.core_type<tc>, window_params = [{transform_indices = @transform_0, window_bounds = array<i64: 8, 32>}, {pipeline_mode = #tpu.pipeline_mode<synchronous>, transform_indices = @transform_1, window_bounds = array<i64: 2, 4, 32>}, {pipeline_mode = #tpu.pipeline_mode<synchronous>, transform_indices = @transform_2, window_bounds = array<i64: 4, 1>}, {transform_indices = @transform_3, window_bounds = array<i64: 4, 8, 32>}, {transform_indices = @transform_4, window_bounds = array<i64: 4, 8>}]} {
    %c0 = arith.constant 0 : index
    %c0_0 = arith.constant 0 : index
    %0 = vector.load %arg1[%c0, %c0_0] : memref<8x32xf32, #tpu.memory_space<vmem>>, vector<8x32xf32>
    %c0_1 = arith.constant 0 : index
    %c0_2 = arith.constant 0 : index
    %c0_3 = arith.constant 0 : index
    %1 = vector.load %arg2[%c0_1, %c0_2, %c0_3] : memref<2x4x32xf32, #tpu.memory_space<vmem>>, vector<1x4x32xf32>
    %2 = vector.shape_cast %1 : vector<1x4x32xf32> to vector<4x32xf32>
    %c1 = arith.constant 1 : index
    %c0_4 = arith.constant 0 : index
    %c0_5 = arith.constant 0 : index
    %3 = vector.load %arg2[%c1, %c0_4, %c0_5] : memref<2x4x32xf32, #tpu.memory_space<vmem>>, vector<1x4x32xf32>
    %4 = vector.shape_cast %3 : vector<1x4x32xf32> to vector<4x32xf32>
    %c0_6 = arith.constant 0 : index
    %c0_7 = arith.constant 0 : index
    %c0_8 = arith.constant 0 : index
    %5 = vector.load %arg4[%c0_6, %c0_7, %c0_8] : memref<4x8x32xi8, #tpu.memory_space<vmem>>, vector<4x8x32xi8>
    %6 = arith.sitofp %5 : vector<4x8x32xi8> to vector<4x8x32xf32>
    %7 = vector.shape_cast %0 : vector<8x32xf32> to vector<1x8x32xf32>
    %8 = vector.shape_cast %2 : vector<4x32xf32> to vector<4x1x32xf32>
    %9 = vector.broadcast %7 : vector<1x8x32xf32> to vector<4x8x32xf32>
    %10 = vector.broadcast %8 : vector<4x1x32xf32> to vector<4x8x32xf32>
    %11 = arith.mulf %9, %10 : vector<4x8x32xf32>
    %cst = arith.constant 0.000000e+00 : f32
    %12 = vector.broadcast %cst : f32 to vector<4x8x32xf32>
    %13 = arith.maximumf %11, %12 : vector<4x8x32xf32>
    %14 = arith.mulf %13, %6 : vector<4x8x32xf32>
    %15 = vector.shape_cast %4 : vector<4x32xf32> to vector<4x1x32xf32>
    %16 = vector.broadcast %15 : vector<4x1x32xf32> to vector<4x8x32xf32>
    %17 = arith.mulf %14, %16 : vector<4x8x32xf32>
    %cst_9 = arith.constant dense<0.000000e+00> : vector<4x8xf32>
    %18 = vector.multi_reduction <add>, %17, %cst_9 [2] : vector<4x8x32xf32> to vector<4x8xf32>
    %c0_10 = arith.constant 0 : index
    %c0_11 = arith.constant 0 : index
    %19 = vector.load %arg3[%c0_10, %c0_11] : memref<4x1xf32, #tpu.memory_space<vmem>>, vector<4x1xf32>
    %20 = vector.broadcast %19 : vector<4x1xf32> to vector<4x8xf32>
    %21 = arith.addf %18, %20 : vector<4x8xf32>
    %c0_12 = arith.constant 0 : index
    %c0_13 = arith.constant 0 : index
    %22 = vector.load %arg5[%c0_12, %c0_13] : memref<4x8xf32, #tpu.memory_space<vmem>>, vector<4x8xf32>
    tpu.vector_store %arg5[%c0_12, %c0_13], %21 {strides = array<i32>} : memref<4x8xf32, #tpu.memory_space<vmem>>, vector<4x8xf32>,
    return
  }
  func.func @transform_0(%arg0: i32) -> (i32, i32) {
    %c0_i32 = arith.constant 0 : i32
    %c0_i32_0 = arith.constant 0 : i32
    return %arg0, %c0_i32 : i32, i32
  }
  func.func @transform_1(%arg0: i32) -> (i32, i32, i32) {
    %c0_i32 = arith.constant 0 : i32
    %c0_i32_0 = arith.constant 0 : i32
    %c0_i32_1 = arith.constant 0 : i32
    %c0_i32_2 = arith.constant 0 : i32
    return %c0_i32, %c0_i32_0, %c0_i32_1 : i32, i32, i32
  }
  func.func @transform_2(%arg0: i32) -> (i32, i32) {
    %c0_i32 = arith.constant 0 : i32
    %c0_i32_0 = arith.constant 0 : i32
    %c0_i32_1 = arith.constant 0 : i32
    return %c0_i32, %c0_i32_0 : i32, i32
  }
  func.func @transform_3(%arg0: i32) -> (i32, i32, i32) {
    %c0_i32 = arith.constant 0 : i32
    %c0_i32_0 = arith.constant 0 : i32
    %c0_i32_1 = arith.constant 0 : i32
    return %c0_i32, %arg0, %c0_i32_0 : i32, i32, i32
  }
  func.func @transform_4(%arg0: i32) -> (i32, i32) {
    %c0_i32 = arith.constant 0 : i32
    %c0_i32_0 = arith.constant 0 : i32
    return %c0_i32, %arg0 : i32, i32
  }
}

</mosaic_0001>

<bundles_post_ra>
// kernel: tpu_custom_call.1
= control target key start
LH: loop header
LB: loop body
LE: loop exit
PB: predicated region body
PF: predicated region fallthrough
CT: control target
= control target key end

     0   :  { %9 = vsyncpa [#allocation3], 0  ;;  %s408_s0 = inlined_call_operand.hbm [shape: f32[8,32], index: 0, kind: input, shape index: {}]   ;;  %s409_s1 = inlined_call_operand.vmem [shape: f32[2,4,32], index: 1, kind: input, shape index: {}]   ;;  %s410_s2 = inlined_call_operand.vmem [shape: f32[4,1], index: 2, kind: input, shape index: {}]   ;;  %s411_s3 = inlined_call_operand.vmem [shape: s8[4,8,32], index: 3, kind: input, shape index: {}]   ;;  %s412_s4 = inlined_call_operand.hbm [shape: f32[4,8], index: 4, kind: output, shape index: {}]  }
   0x1   :  { %10 = vsyncpa [#allocation4], 0  ;;  %s318_s15 = smov [#allocation2]   ;;  %s270_s19 = scalar_lea.hbm %s408_s0, 128 }
   0x2   :  { %s17_s16 = sshll.u32 %s318_s15, 4  ;;  %p271_p0 = scmp.ne.s32.totalorder %s408_s0, %s270_s19  ;;  %s18_s16 = int_to_ptr.vmem [resolvable:$true] %s17_s16 }
   0x3   :  { %p274_p1 = scmp.lt.u32.totalorder %s270_s19, %s408_s0 }
   0x5   :  { %p276_p2 = pnand %p274_p1, %p271_p0 }
   0x7   :  { %279 = shalt.err (!%p276_p2)
}
   0x8   :  { %s280_s24 = scalar_lea.vmem %s18_s16, 128  ;;  %p285_p4 = scmp.lt.s32.totalorder %s18_s16, %s18_s16 }
   0x9   :  { %p281_p3 = scmp.ne.s32.totalorder %s18_s16, %s280_s24  ;;  %p286_p5 = scmp.lt.s32.totalorder %s280_s24, %s280_s24 }
   0xb   :  { %p287_p6 = por %p286_p5, %p285_p4 }
   0xd   :  { %p288_p7 = pnand %p287_p6, %p281_p3 }
   0xf   :  { %291 = shalt.err (!%p288_p7)
}
  0x10   :  { %20 = dma.hbm_to_vmem [thread:$0]  %s408_s0, 128, %s18_s16, [#allocation3]  }
  0x11   :  { %314 = dma.done.wait [#allocation3], 128  }
  0x12   :  { %315 = vsyncadd [#allocation3], 4294967168  ;;  %v58_v0 = vlaneseq  ;;  %v319_v1 = vmov 1966171168   ;;  %v320_v3 = vmov 0   ;;  %v256_v9 = vld [vmem:[%s411_s3] sm:$0xff]  }
  0x13   :  { %v56_v2 = vunpack.c.l.s4 %v319_v1  ;;  %268 = vset.pattern.permute.xlu0 %v320_v3  ;;  %269 = vset.pattern.permute.xlu1 %v320_v3  ;;  %v253_v8 = vld.sshfl [vmem:[%s409_s1] sm:$0x33 pattern:$0x75316420]  ;;  %v257_v11 = vunpack.c.0.s8 %v256_v9  ;;  %v258_v18 = vunpack.c.1.s8 %v256_v9  ;;  %v261_v20 = vunpack.c.2.s8 %v256_v9 }
  0x14   :  { %v360_v4 = vshrl.u32 %v58_v0, 7  ;;  %v254_v10 = vld.sshfl [vmem:[%s409_s1 + $0x4] sm:$0x33 pattern:$0x75316420]  ;;  %v54_v12 = vcombine.high %v253_v8, %v253_v8  ;;  %v262_v28 = vunpack.c.3.s8 %v256_v9  ;;  %vm152_vm0 = vcmask 261120  }
  0x15   :  { %v57_v5 = vunpack.c.0.s8 %v56_v2  ;;  %v30_v14 = vld [vmem:[#allocation2] sm:$0xff]  ;;  %v111_v15 = vcombine.high %v254_v10, %v254_v10  ;;  %v42_v22 = vcvt.s32.f32 %v257_v11  ;;  %v43_v32 = vcvt.s32.f32 %v258_v18 }
  0x16   :  { %v364_v7 = vsub.s32 0, %v360_v4  ;;  %v44_v34 = vcvt.s32.f32 %v261_v20  ;;  %v45_v43 = vcvt.s32.f32 %v262_v28  ;;  %v165_v58 = vld [vmem:[%s410_s2] sm:$0xf]  ;;  %v211_v59 = vand.u32 127, %v58_v0  ;;  %s321_s2 = smov [#allocation5]  }
  0x17   :  { %v60_v6 = vsub.s32 %v57_v5, %v360_v4  ;;  %v176_v63 = vsub.s32 1, %v360_v4  ;;  %v180_v3 = vsub.s32 2, %v360_v4  ;;  %vm228_vm1 = vcmask 1041409   ;;  %s243_s6 = sshll.u32 %s321_s2, 4  ;;  %s244_s6 = int_to_ptr.vmem [resolvable:$true] %s243_s6 }
  0x18   :  { %v214_v60 = vsub.s32 %v211_v59, %v360_v4  ;;  %vm230_vm2 = vcmask 1042434   ;;  %vm232_vm3 = vcmask 1043459   ;;  %vm235_vm4 = vcmask 60416   ;;  %s292_s7 = scalar_lea.vmem %s244_s6, 64  ;;  %p297_p9 = scmp.lt.s32.totalorder %s244_s6, %s244_s6 }
  0x19   :  { %v61_v13 = vrot.slane %v253_v8, %v60_v6  ;;  %v118_v17 = vrot.slane %v254_v10, %v60_v6  ;;  %v68_v19 = vrot.slane %v54_v12, %v60_v6  ;;  %v125_v25 = vrot.slane %v111_v15, %v60_v6  ;;  %p293_p8 = scmp.ne.s32.totalorder %s244_s6, %s292_s7  ;;  %p298_p10 = scmp.lt.s32.totalorder %s292_s7, %s292_s7 }
  0x1a   :  { %v184_v10 = vsub.s32 3, %v360_v4 }
  0x1b   :  { %v74_v16 = vrot.slane %v61_v13, %v364_v7  ;;  %v69_v21 = vcombine.high %v61_v13, %v61_v13  ;;  %v78_v24 = vrot.slane %v68_v19, %v364_v7  ;;  %v126_v27 = vcombine.high %v118_v17, %v118_v17  ;;  %p299_p11 = por %p298_p10, %p297_p9 }
  0x1c   :  { %v70_v29 = vcombine.high %v68_v19, %v68_v19  ;;  %v131_v31 = vrot.slane %v118_v17, %v364_v7  ;;  %v127_v37 = vcombine.high %v125_v25, %v125_v25  ;;  %v135_v40 = vrot.slane %v125_v25, %v364_v7 }
  0x1d   :  { %v91_v23 = vmul.f32 %v74_v16, %v30_v14  ;;  %v82_v26 = vrot.slane %v69_v21, %v364_v7  ;;  %v92_v33 = vmul.f32 %v78_v24, %v30_v14  ;;  %v139_v42 = vrot.slane %v126_v27, %v364_v7  ;;  %p300_p12 = pnand %p299_p11, %p293_p8 }
  0x1e   :  { %v86_v36 = vrot.slane %v70_v29, %v364_v7  ;;  %v143_v49 = vrot.slane %v127_v37, %v364_v7 }
  0x1f   :  { %v95_v30 = vmax.f32 %v91_v23, 0.0  ;;  %v93_v35 = vmul.f32 %v82_v26, %v30_v14  ;;  %v96_v39 = vmax.f32 %v92_v33, 0.0 }
  0x20   :  { %v94_v44 = vmul.f32 %v86_v36, %v30_v14 }
  0x21   :  { %v99_v38 = vmul.f32 %v95_v30, %v42_v22  ;;  %v97_v41 = vmax.f32 %v93_v35, 0.0  ;;  %v100_v46 = vmul.f32 %v96_v39, %v43_v32 }
  0x22   :  { %v98_v48 = vmax.f32 %v94_v44, 0.0 }
  0x23   :  { %v148_v45 = vmul.f32 %v131_v31, %v99_v38  ;;  %v101_v47 = vmul.f32 %v97_v41, %v44_v34  ;;  %v149_v51 = vmul.f32 %v135_v40, %v100_v46 }
  0x24   :  { %v102_v53 = vmul.f32 %v98_v48, %v45_v43 }
  0x25   :  { %v153_v50 = vsel %vm152_vm0, %v148_v45, 0.0  ;;  %v150_v52 = vmul.f32 %v139_v42, %v101_v47  ;;  %v156_v54 = vsel %vm152_vm0, %v149_v51, 0.0 }
  0x26   :  { %154 = vadd.xlane.f32.xlu0 %v153_v50  ;;  %v151_v56 = vmul.f32 %v143_v49, %v102_v53 }
  0x27   :  { %v159_v55 = vsel %vm152_vm0, %v150_v52, 0.0 }
  0x28   :  { %160 = vadd.xlane.f32.xlu1 %v159_v55  ;;  %v162_v57 = vsel %vm152_vm0, %v151_v56, 0.0 }
  0x2a   :  { %157 = vadd.xlane.f32.xlu0 %v156_v54 }
  0x2c   :  { %163 = vadd.xlane.f32.xlu1 %v162_v57 }
  0x40   :  { %168 = vperm.xlu0 %268, %v165_v58  }
  0xb3   :  { %v155_v61 = vpop.xlane.xlu0 %154 }
  0xb5   :  { %v161_v8 = vpop.xlane.xlu1 %160 }
  0xb7   :  { %v158_v62 = vpop.xlane.xlu0 %157 }
  0xb9   :  { %v164_v13 = vpop.xlane.xlu1 %163 }
  0xbf   :  { %v169_v1 = vpop.permute.xlu0 %168 }
  0xc0   :  { %v173_v2 = vrot.slane %v169_v1, %v364_v7  ;;  %v177_v5 = vrot.slane %v169_v1, %v176_v63  ;;  %v181_v9 = vrot.slane %v169_v1, %v180_v3  ;;  %v185_v0 = vrot.slane %v169_v1, %v184_v10 }
  0xc2   :  { %v190_v6 = vadd.f32 %v173_v2, %v155_v61  ;;  %v191_v11 = vadd.f32 %v177_v5, %v158_v62  ;;  %v192_v12 = vadd.f32 %v181_v9, %v161_v8  ;;  %v193_v14 = vadd.f32 %v185_v0, %v164_v13 }
  0xc4   :  { %199 = vperm.xlu1 %269, %v190_v6  }
  0xc8   :  { %202 = vperm.xlu1 %269, %v191_v11  }
  0xcc   :  { %205 = vperm.xlu1 %269, %v192_v12  }
  0xd0   :  { %208 = vperm.xlu1 %269, %v193_v14  }
 0x143   :  { %v200_v15 = vpop.permute.xlu1 %199 }
 0x144   :  { %v215_v19 = vrot.slane %v200_v15, %v214_v60 }
 0x147   :  { %v203_v16 = vpop.permute.xlu1 %202 }
 0x148   :  { %v219_v17 = vrot.slane %v203_v16, %v214_v60 }
 0x14a   :  { %v229_v4 = vsel %vm228_vm1, %v219_v17, %v215_v19 }
 0x14b   :  { %v206_v7 = vpop.permute.xlu1 %205 }
 0x14c   :  { %v223_v18 = vrot.slane %v206_v7, %v214_v60 }
 0x14e   :  { %v231_v22 = vsel %vm230_vm2, %v223_v18, %v229_v4 }
 0x14f   :  { %v209_v20 = vpop.permute.xlu1 %208 }
 0x150   :  { %v227_v21 = vrot.slane %v209_v20, %v214_v60 }
 0x152   :  { %v233_v23 = vsel %vm232_vm3, %v227_v21, %v231_v22 }
 0x153   :  { %236 = vst.msk [vmem:[#allocation5] sm:$0xf] %vm235_vm4, %v233_v23 }
 0x154   :  { %303 = shalt.err (!%p300_p12)
}
 0x155   :  { %s304_s10 = scalar_lea.hbm %s412_s4, 64 }
 0x156   :  { %p305_p13 = scmp.ne.s32.totalorder %s412_s4, %s304_s10  ;;  %p308_p0 = scmp.lt.u32.totalorder %s304_s10, %s412_s4 }
 0x158   :  { %p310_p1 = pnand %p308_p0, %p305_p13 }
 0x15a   :  { %313 = shalt.err (!%p310_p1)
}
 0x15b   :  { %246 = dma.vmem_to_hbm [thread:$0]  %s244_s6, 64, %s412_s4, [#allocation4]  }
 0x15c   :  { %316 = dma.done.wait [#allocation4], 64  }
 0x15d   :  { %317 = vsyncadd [#allocation4], 4294967232 }
 0x15e   :  { %250 = vsyncpa [#allocation3], 1 }
 0x15f   :  { %251 = vsyncpa [#allocation4], 1 }

</bundles_post_ra>
